<compile_context>
chip_gen: v7x
topology: tpu7x:2x2x1
jax: 0.10.0
libtpu: 0.0.40
codegen_flags: <defaults>
</compile_context>

<pallas_src>
import functools
import inspect

import jax
import jax.numpy as jnp
from jax.experimental import pallas as pl
from jax.experimental.pallas import tpu as pltpu


# --------------------------------------------------------------------------- #
# Kernel
# --------------------------------------------------------------------------- #
def latent_encoder_kernel(enc_ref, wcat_ref, bcat_ref,   # [bt,d_xy,nt], [RW,C], [3,C]
                          out_ref,                       # [bt, 2L]  (= [mu | sigma])
                          acc_ref,                       # VMEM scratch [bt, h0, 1]
                          *, n_total, d_xy, h0, h1, nh, num_latents, o1, o2, o3):
    ni = pl.program_id(1)

    @pl.when(ni == 0)
    def _init():
        acc_ref[...] = jnp.zeros_like(acc_ref)

    enc = enc_ref[...]                                   # [bt, d_xy, nt]

    # ---- BatchMLP layer 0 on the VPU (K is only 3; the MXU would be >99% idle).
    # Activation layout [bt, h0, nt]: h0 dense on sublanes, observations dense
    # on lanes.  Weights are stored transposed in wcat so no in-kernel relayout
    # is needed to get [h0, 1]-shaped broadcast operands.
    w0t = wcat_ref[0:h0, 0:d_xy]                         # [h0, d_xy]  (= w0^T)
    b0t = wcat_ref[0:h0, d_xy:d_xy + 1]                  # [h0, 1]     (= b0^T)

    h = b0t[None, :, :]                                  # [1, h0, 1]
    for k in range(d_xy):                                # static unroll (d_xy == 3)
        h = h + w0t[:, k:k + 1][None, :, :] * enc[:, k:k + 1, :]
    h = jnp.maximum(h, 0.0)                              # [bt, h0, nt]

    # Partial sum over this tile's observations; the mean (and everything that
    # only depends on the per-batch mean) is finalized on the last N tile.
    acc_ref[...] += jnp.sum(h, axis=2, keepdims=True)    # [bt, h0, 1]

    @pl.when(ni == pl.num_programs(1) - 1)
    def _finalize():
        L = num_latents
        hm = acc_ref[...][:, :, 0] * (1.0 / float(n_total))          # [bt, h0]

        w1 = wcat_ref[o1:o1 + h0, 0:h1]
        wp = wcat_ref[o2:o2 + h1, 0:nh]
        wh = wcat_ref[o3:o3 + nh, 0:2 * L]
        b1 = bcat_ref[0:1, 0:h1]
        bp = bcat_ref[1:2, 0:nh]
        bh = bcat_ref[2:3, 0:2 * L]

        # BatchMLP layer 1 is linear (no ReLU) so mean_n(layer1(h)) == layer1(mean_n(h)).
        z = jnp.dot(hm, w1, preferred_element_type=jnp.float32) + b1            # [bt, h1]
        z = jnp.maximum(jnp.dot(z, wp, preferred_element_type=jnp.float32) + bp, 0.0)
        head = jnp.dot(z, wh, preferred_element_type=jnp.float32) + bh          # [bt, 2L]

        # Single fused store: lanes [0, L) hold mu, lanes [L, 2L) hold sigma.
        lane = jax.lax.broadcasted_iota(jnp.int32, head.shape, 1)
        out_ref[...] = jnp.where(lane < L, head,
                                 0.1 + 0.9 * jax.nn.softplus(head))


# --------------------------------------------------------------------------- #
# Host-side helpers
# --------------------------------------------------------------------------- #
def _round_up(v, q):
    return -(-v // q) * q


def _hbm_bytes(shape, itemsize=4):
    """Approximate padded HBM footprint under XLA's (8, 128) minor tiling."""
    dims = list(shape)
    if len(dims) >= 1:
        dims[-1] = _round_up(dims[-1], 128)
    if len(dims) >= 2:
        dims[-2] = _round_up(dims[-2], 8)
    n = itemsize
    for d in dims:
        n *= d
    return n


def _vmem_limit_bytes():
    """~3/4 of physical VMEM (v5e/v6e: 128 MiB, v7x: 64 MiB/TC); conservative fallback."""
    phys = 64 * 1024 * 1024
    try:
        info = pltpu.get_tpu_info()
        phys = int(getattr(info, "vmem_capacity_bytes", phys))
    except Exception:
        pass
    return int(phys * 3 // 4)


def _supports_buffered():
    try:
        return (hasattr(pl, "Buffered")
                and "pipeline_mode" in inspect.signature(pl.BlockSpec).parameters)
    except Exception:
        return False


def _pick_tile(dim, cap, quantum):
    """Largest t <= cap with dim % t == 0 and t % quantum == 0, else the full dim."""
    if dim <= cap:
        return dim
    for t in range(min(cap, dim), quantum - 1, -1):
        if dim % t == 0 and t % quantum == 0:
            return t
    # TODO(synk): pad/mask remainder tiles instead of falling back to the full
    # dimension (full-dim fallback can blow the VMEM budget for awkward B/N).
    return dim


def make_params(key, xy_size, output_sizes, num_latents):
    """Deterministic synthetic parameters (Linear weights as [in, out], bias [1, out])."""
    n_hidden = (output_sizes[-1] + num_latents) // 2
    dims = [("w0", xy_size, output_sizes[0]),
            ("w1", output_sizes[0], output_sizes[1]),
            ("wp", output_sizes[1], n_hidden),
            ("wmu", n_hidden, num_latents),
            ("wls", n_hidden, num_latents)]
    params = {}
    keys = jax.random.split(key, 2 * len(dims))
    for i, (name, d_in, d_out) in enumerate(dims):
        params[name] = (0.1 * jax.random.normal(keys[2 * i], (d_in, d_out))
                        ).astype(jnp.float32)
        params["b" + name[1:]] = (0.1 * jax.random.normal(keys[2 * i + 1], (1, d_out))
                                  ).astype(jnp.float32)
    return params


def pack_params(params):
    """Pack all Linear weights/biases into two contiguous buffers.

    wcat rows (every section starts at a multiple-of-8 sublane offset):
      [0 : h0)        -> [w0^T | b0^T]   ([h0, d_xy + 1])  -- VPU layer-0 operands
      [o1 : o1 + h0)  -> w1              ([h0, h1])
      [o2 : o2 + h1)  -> wp              ([h1, nh])
      [o3 : o3 + nh)  -> [wmu | wls]     ([nh, 2L], fused mu/log_sigma head)
    bcat rows: b1, bp, [bmu | bls].
    """
    w0, b0 = params["w0"], params["b0"]
    w1, b1 = params["w1"], params["b1"]
    wp, bp = params["wp"], params["bp"]
    wh = jnp.concatenate([params["wmu"], params["wls"]], axis=1)
    bh = jnp.concatenate([params["bmu"], params["bls"]], axis=1)

    d_xy, h0 = w0.shape
    h1 = w1.shape[1]
    nh = wp.shape[1]
    two_l = wh.shape[1]

    r8 = lambda v: -(-v // 8) * 8
    o1 = r8(h0)
    o2 = o1 + r8(h0)
    o3 = o2 + r8(h1)
    rows = o3 + r8(nh)
    cols = max(d_xy + 1, h1, nh, two_l)

    wcat = jnp.zeros((rows, cols), jnp.float32)
    wcat = wcat.at[0:h0, 0:d_xy + 1].set(
        jnp.concatenate([w0.T, b0.T], axis=1).astype(jnp.float32))
    wcat = wcat.at[o1:o1 + h0, 0:h1].set(w1.astype(jnp.float32))
    wcat = wcat.at[o2:o2 + h1, 0:nh].set(wp.astype(jnp.float32))
    wcat = wcat.at[o3:o3 + nh, 0:two_l].set(wh.astype(jnp.float32))

    bcat = jnp.zeros((3, cols), jnp.float32)
    bcat = bcat.at[0, 0:h1].set(b1[0].astype(jnp.float32))
    bcat = bcat.at[1, 0:nh].set(bp[0].astype(jnp.float32))
    bcat = bcat.at[2, 0:two_l].set(bh[0].astype(jnp.float32))

    return {"wcat": wcat, "bcat": bcat,
            "dims": dict(d_xy=int(d_xy), h0=int(h0), h1=int(h1), nh=int(nh),
                         L=int(two_l // 2), o1=int(o1), o2=int(o2), o3=int(o3))}


def latent_encoder_forward(x, y, packed, *, b_tile_cap=8, n_tile_cap=2048):
    """Returns (mu, sigma) of the Normal distribution produced by LatentEncoder."""
    dims = packed["dims"]
    d_xy, h0, h1, nh, L = dims["d_xy"], dims["h0"], dims["h1"], dims["nh"], dims["L"]
    o1, o2, o3 = dims["o1"], dims["o2"], dims["o3"]
    wcat, bcat = packed["wcat"], packed["bcat"]

    x = x.astype(jnp.float32)
    y = y.astype(jnp.float32)
    B, N, d_x = x.shape
    d_y = y.shape[-1]
    assert d_x + d_y == d_xy

    # Lane-dense relayout: observations on the 128-lane axis, the tiny feature
    # axis on sublanes (3 -> 8 pad instead of 3 -> 128 pad).  This single XLA
    # transpose+concat over the true data replaces ~64x-padded per-tile DMAs.
    enc = jnp.concatenate(
        [jnp.swapaxes(x, 1, 2), jnp.swapaxes(y, 1, 2)], axis=1)     # [B, d_xy, N]

    # ---- Generation-aware tiling / VMEM budget ------------------------------
    vmem_limit = _vmem_limit_bytes()
    b_cap = b_tile_cap
    if B >= 16:
        b_cap = min(b_tile_cap, max(8, B // 2))   # keep >= 2 batch tiles for v7x's 2 TCs
    bt = _pick_tile(B, b_cap, 8)
    # Approx bytes per lane-column per step: double-buffered enc block (3->8 pad)
    # plus layer-0 [bt, h0, nt] intermediates.
    per_col_bytes = 4 * bt * (3 * 8 + 3 * h0)
    nt_cap = max(128, min(n_tile_cap,
                          (max(vmem_limit // 2, 4 << 20) // per_col_bytes // 128) * 128))
    nt = _pick_tile(N, nt_cap, 128)
    grid = (B // bt, N // nt)

    kernel = functools.partial(
        latent_encoder_kernel, n_total=N, d_xy=d_xy, h0=h0, h1=h1, nh=nh,
        num_latents=L, o1=o1, o2=o2, o3=o3)

    enc_kwargs = {}
    if grid[0] * grid[1] >= 3 and _supports_buffered():
        # Deeper input pipelining hides HBM latency when per-tile compute is
        # small (matters most on v5e's lower HBM bandwidth).
        enc_kwargs["pipeline_mode"] = pl.Buffered(3)

    in_specs = [
        pl.BlockSpec((bt, d_xy, nt), lambda bi, ni: (bi, 0, ni), **enc_kwargs),
        pl.BlockSpec(wcat.shape, lambda bi, ni: (0, 0)),
        pl.BlockSpec(bcat.shape, lambda bi, ni: (0, 0)),
    ]
    out_spec = pl.BlockSpec((bt, 2 * L), lambda bi, ni: (bi, 0))

    cost = pl.CostEstimate(
        flops=(2 * B * N * d_xy * h0 + B * N * h0
               + 2 * B * (h0 * h1 + h1 * nh + nh * 2 * L)),
        transcendentals=2 * B * 2 * L,                  # softplus ~= exp + log1p
        bytes_accessed=(_hbm_bytes(enc.shape) + _hbm_bytes(wcat.shape)
                        + _hbm_bytes(bcat.shape) + _hbm_bytes((B, 2 * L))),
    )

    out = pl.pallas_call(
        kernel,
        out_shape=jax.ShapeDtypeStruct((B, 2 * L), jnp.float32),
        grid_spec=pltpu.PrefetchScalarGridSpec(
            num_scalar_prefetch=0,
            grid=grid,
            in_specs=in_specs,
            out_specs=out_spec,
            scratch_shapes=[pltpu.VMEM((bt, h0, 1), jnp.float32)],
        ),
        compiler_params=pltpu.CompilerParams(
            dimension_semantics=("parallel", "arbitrary"),
            vmem_limit_bytes=vmem_limit,
        ),
        cost_estimate=cost,
    )(enc, wcat, bcat)

    return out[:, :L], out[:, L:]


def reference_forward(x, y, params):
    """Pure-JAX reference mirroring the PyTorch LatentEncoder.forward."""
    enc = jnp.concatenate([x, y], axis=-1)
    h = jax.nn.relu(jnp.einsum('bnd,dh->bnh', enc, params["w0"]) + params["b0"])
    h = jnp.einsum('bnh,hk->bnk', h, params["w1"]) + params["b1"]
    h = jnp.mean(h, axis=1)
    h = jax.nn.relu(h @ params["wp"] + params["bp"])
    mu = h @ params["wmu"] + params["bmu"]
    log_sigma = h @ params["wls"] + params["bls"]
    sigma = 0.1 + 0.9 * jax.nn.softplus(log_sigma)
    return mu, sigma


if __name__ == "__main__":
    # Small shapes consistent with the module's forward.
    B, N, d_x, d_y = 2, 8, 2, 1
    output_sizes = [32, 32]
    num_latents = 16

    key = jax.random.PRNGKey(0)
    kx, ky, kp = jax.random.split(key, 3)
    x = jax.random.normal(kx, (B, N, d_x), dtype=jnp.float32)
    y = jax.random.normal(ky, (B, N, d_y), dtype=jnp.float32)
    params = make_params(kp, d_x + d_y, output_sizes, num_latents)
    packed = pack_params(params)

    mu, sigma = latent_encoder_forward(x, y, packed)
    mu, sigma = jax.block_until_ready((mu, sigma))

    mu_ref, sigma_ref = reference_forward(x, y, params)
    assert jnp.allclose(mu, mu_ref, atol=1e-5, rtol=1e-5)
    assert jnp.allclose(sigma, sigma_ref, atol=1e-5, rtol=1e-5)
    assert bool(jnp.all(sigma > 0.0))

    print("KERNEL_OK")
</pallas_src>

<mosaic_0001>
module attributes {stable_mosaic.version = 11 : i64} {
  func.func @latent_encoder_kernel(%arg0: i32, %arg1: i32, %arg2: memref<2x3x8xf32, #tpu.memory_space<vmem>>, %arg3: memref<120x32xf32, #tpu.memory_space<vmem>>, %arg4: memref<3x32xf32, #tpu.memory_space<vmem>>, %arg5: memref<2x32xf32, #tpu.memory_space<vmem>>, %arg6: memref<2x32x1xf32, #tpu.memory_space<vmem>>) attributes {dimension_semantics = [#tpu.dimension_semantics<parallel>, #tpu.dimension_semantics<arbitrary>], iteration_bounds = array<i64: 1, 1>, scalar_prefetch = 0 : i64, scratch_operands = 1 : i64, tpu.core_type = #tpu.core_type<tc>, window_params = [{transform_indices = @transform_0, window_bounds = array<i64: 2, 3, 8>}, {pipeline_mode = #tpu.pipeline_mode<synchronous>, transform_indices = @transform_1, window_bounds = array<i64: 120, 32>}, {pipeline_mode = #tpu.pipeline_mode<synchronous>, transform_indices = @transform_2, window_bounds = array<i64: 3, 32>}, {transform_indices = @transform_3, window_bounds = array<i64: 2, 32>}]} {
    %c0_i32 = arith.constant 0 : i32
    %0 = arith.cmpi eq, %arg1, %c0_i32 : i32
    %1 = arith.extui %0 : i1 to i32
    %c0_i32_0 = arith.constant 0 : i32
    %2 = arith.cmpi ne, %1, %c0_i32_0 : i32
    scf.if %2 {
      %cst_15 = arith.constant 0.000000e+00 : f32
      %39 = vector.broadcast %cst_15 : f32 to vector<2x32x1xf32>
      %c0_16 = arith.constant 0 : index
      %c0_17 = arith.constant 0 : index
      %c0_18 = arith.constant 0 : index
      %40 = vector.load %arg6[%c0_16, %c0_17, %c0_18] : memref<2x32x1xf32, #tpu.memory_space<vmem>>, vector<2x32x1xf32>
      tpu.vector_store %arg6[%c0_16, %c0_17, %c0_18], %39 {strides = array<i32>} : memref<2x32x1xf32, #tpu.memory_space<vmem>>, vector<2x32x1xf32>,
    } else {
    }
    %c0 = arith.constant 0 : index
    %c0_1 = arith.constant 0 : index
    %c0_2 = arith.constant 0 : index
    %3 = vector.load %arg2[%c0, %c0_1, %c0_2] : memref<2x3x8xf32, #tpu.memory_space<vmem>>, vector<2x3x8xf32>
    %c0_3 = arith.constant 0 : index
    %c0_4 = arith.constant 0 : index
    %4 = vector.load %arg3[%c0_3, %c0_4] : memref<120x32xf32, #tpu.memory_space<vmem>>, vector<32x3xf32>
    %c0_5 = arith.constant 0 : index
    %c3 = arith.constant 3 : index
    %5 = vector.load %arg3[%c0_5, %c3] : memref<120x32xf32, #tpu.memory_space<vmem>>, vector<32x1xf32>
    %6 = vector.shape_cast %5 : vector<32x1xf32> to vector<1x32x1xf32>
    %7 = vector.extract_strided_slice %4 {offsets = [0, 0], sizes = [32, 1], strides = [1, 1]} : vector<32x3xf32> to vector<32x1xf32>
    %8 = vector.shape_cast %7 : vector<32x1xf32> to vector<1x32x1xf32>
    %9 = vector.extract_strided_slice %3 {offsets = [0, 0, 0], sizes = [2, 1, 8], strides = [1, 1, 1]} : vector<2x3x8xf32> to vector<2x1x8xf32>
    %10 = vector.broadcast %8 : vector<1x32x1xf32> to vector<2x32x8xf32>
    %11 = vector.broadcast %9 : vector<2x1x8xf32> to vector<2x32x8xf32>
    %12 = arith.mulf %10, %11 : vector<2x32x8xf32>
    %13 = vector.broadcast %6 : vector<1x32x1xf32> to vector<2x32x8xf32>
    %14 = arith.addf %13, %12 : vector<2x32x8xf32>
    %15 = vector.extract_strided_slice %4 {offsets = [0, 1], sizes = [32, 1], strides = [1, 1]} : vector<32x3xf32> to vector<32x1xf32>
    %16 = vector.shape_cast %15 : vector<32x1xf32> to vector<1x32x1xf32>
    %17 = vector.extract_strided_slice %3 {offsets = [0, 1, 0], sizes = [2, 1, 8], strides = [1, 1, 1]} : vector<2x3x8xf32> to vector<2x1x8xf32>
    %18 = vector.broadcast %16 : vector<1x32x1xf32> to vector<2x32x8xf32>
    %19 = vector.broadcast %17 : vector<2x1x8xf32> to vector<2x32x8xf32>
    %20 = arith.mulf %18, %19 : vector<2x32x8xf32>
    %21 = arith.addf %14, %20 : vector<2x32x8xf32>
    %22 = vector.extract_strided_slice %4 {offsets = [0, 2], sizes = [32, 1], strides = [1, 1]} : vector<32x3xf32> to vector<32x1xf32>
    %23 = vector.shape_cast %22 : vector<32x1xf32> to vector<1x32x1xf32>
    %24 = vector.extract_strided_slice %3 {offsets = [0, 2, 0], sizes = [2, 1, 8], strides = [1, 1, 1]} : vector<2x3x8xf32> to vector<2x1x8xf32>
    %25 = vector.broadcast %23 : vector<1x32x1xf32> to vector<2x32x8xf32>
    %26 = vector.broadcast %24 : vector<2x1x8xf32> to vector<2x32x8xf32>
    %27 = arith.mulf %25, %26 : vector<2x32x8xf32>
    %28 = arith.addf %21, %27 : vector<2x32x8xf32>
    %cst = arith.constant 0.000000e+00 : f32
    %29 = vector.broadcast %cst : f32 to vector<2x32x8xf32>
    %30 = arith.maximumf %28, %29 : vector<2x32x8xf32>
    %c0_6 = arith.constant 0 : index
    %c0_7 = arith.constant 0 : index
    %c0_8 = arith.constant 0 : index
    %31 = vector.load %arg6[%c0_6, %c0_7, %c0_8] : memref<2x32x1xf32, #tpu.memory_space<vmem>>, vector<2x32x1xf32>
    %cst_9 = arith.constant dense<0.000000e+00> : vector<2x32xf32>
    %32 = vector.multi_reduction <add>, %30, %cst_9 [2] : vector<2x32x8xf32> to vector<2x32xf32>
    %33 = vector.shape_cast %32 : vector<2x32xf32> to vector<2x32x1xf32>
    %34 = arith.addf %31, %33 : vector<2x32x1xf32>
    %c0_10 = arith.constant 0 : index
    %c0_11 = arith.constant 0 : index
    %c0_12 = arith.constant 0 : index
    %35 = vector.load %arg6[%c0_10, %c0_11, %c0_12] : memref<2x32x1xf32, #tpu.memory_space<vmem>>, vector<2x32x1xf32>
    tpu.vector_store %arg6[%c0_10, %c0_11, %c0_12], %34 {strides = array<i32>} : memref<2x32x1xf32, #tpu.memory_space<vmem>>, vector<2x32x1xf32>,
    %c0_i32_13 = arith.constant 0 : i32
    %36 = arith.cmpi eq, %arg1, %c0_i32_13 : i32
    %37 = arith.extui %36 : i1 to i32
    %c0_i32_14 = arith.constant 0 : i32
    %38 = arith.cmpi ne, %37, %c0_i32_14 : i32
    scf.if %38 {
      %c0_15 = arith.constant 0 : index
      %c0_16 = arith.constant 0 : index
      %c0_17 = arith.constant 0 : index
      %39 = vector.load %arg6[%c0_15, %c0_16, %c0_17] : memref<2x32x1xf32, #tpu.memory_space<vmem>>, vector<2x32x1xf32>
      %40 = vector.shape_cast %39 : vector<2x32x1xf32> to vector<2x32xf32>
      %cst_18 = arith.constant 1.250000e-01 : f32
      %41 = vector.broadcast %cst_18 : f32 to vector<2x32xf32>
      %42 = arith.mulf %40, %41 : vector<2x32xf32>
      %c32 = arith.constant 32 : index
      %c0_19 = arith.constant 0 : index
      %43 = vector.load %arg3[%c32, %c0_19] : memref<120x32xf32, #tpu.memory_space<vmem>>, vector<32x32xf32>
      %c64 = arith.constant 64 : index
      %c0_20 = arith.constant 0 : index
      %44 = vector.load %arg3[%c64, %c0_20] : memref<120x32xf32, #tpu.memory_space<vmem>>, vector<32x24xf32>
      %c96 = arith.constant 96 : index
      %c0_21 = arith.constant 0 : index
      %45 = vector.load %arg3[%c96, %c0_21] : memref<120x32xf32, #tpu.memory_space<vmem>>, vector<24x32xf32>
      %c0_22 = arith.constant 0 : index
      %c0_23 = arith.constant 0 : index
      %46 = vector.load %arg4[%c0_22, %c0_23] : memref<3x32xf32, #tpu.memory_space<vmem>>, vector<1x32xf32>
      %c1 = arith.constant 1 : index
      %c0_24 = arith.constant 0 : index
      %47 = vector.load %arg4[%c1, %c0_24] : memref<3x32xf32, #tpu.memory_space<vmem>>, vector<1x24xf32>
      %c2 = arith.constant 2 : index
      %c0_25 = arith.constant 0 : index
      %48 = vector.load %arg4[%c2, %c0_25] : memref<3x32xf32, #tpu.memory_space<vmem>>, vector<1x32xf32>
      %cst_26 = arith.constant dense<0.000000e+00> : vector<2x32xf32>
      %49 = tpu.matmul %42, %43, %cst_26 {dimension_numbers = #tpu.dot_dimension_numbers<[1], [0], [0], [1], [0, 0, 1, 1], [], []>} : vector<2x32xf32>, vector<32x32xf32>, vector<2x32xf32> -> vector<2x32xf32>
      %50 = vector.broadcast %46 : vector<1x32xf32> to vector<2x32xf32>
      %51 = arith.addf %49, %50 : vector<2x32xf32>
      %cst_27 = arith.constant dense<0.000000e+00> : vector<2x24xf32>
      %52 = tpu.matmul %51, %44, %cst_27 {dimension_numbers = #tpu.dot_dimension_numbers<[1], [0], [0], [1], [0, 0, 1, 1], [], []>} : vector<2x32xf32>, vector<32x24xf32>, vector<2x24xf32> -> vector<2x24xf32>
      %53 = vector.broadcast %47 : vector<1x24xf32> to vector<2x24xf32>
      %54 = arith.addf %52, %53 : vector<2x24xf32>
      %cst_28 = arith.constant 0.000000e+00 : f32
      %55 = vector.broadcast %cst_28 : f32 to vector<2x24xf32>
      %56 = arith.maximumf %54, %55 : vector<2x24xf32>
      %cst_29 = arith.constant dense<0.000000e+00> : vector<2x32xf32>
      %57 = tpu.matmul %56, %45, %cst_29 {dimension_numbers = #tpu.dot_dimension_numbers<[1], [0], [0], [1], [0, 0, 1, 1], [], []>} : vector<2x24xf32>, vector<24x32xf32>, vector<2x32xf32> -> vector<2x32xf32>
      %58 = vector.broadcast %48 : vector<1x32xf32> to vector<2x32xf32>
      %59 = arith.addf %57, %58 : vector<2x32xf32>
      %60 = tpu.iota {dimensions = array<i32: 1>} : vector<2x32xi32>
      %c16_i32 = arith.constant 16 : i32
      %61 = vector.broadcast %c16_i32 : i32 to vector<2x32xi32>
      %62 = arith.cmpi slt, %60, %61 : vector<2x32xi32>
      %cst_30 = arith.constant 0.000000e+00 : f32
      %63 = vector.broadcast %cst_30 : f32 to vector<2x32xf32>
      %64 = arith.maximumf %59, %63 : vector<2x32xf32>
      %65 = vector.broadcast %cst_30 : f32 to vector<2x32xf32>
      %66 = arith.subf %59, %65 : vector<2x32xf32>
      %67 = arith.cmpf one, %66, %66 : vector<2x32xf32>
      %68 = vector.broadcast %cst_30 : f32 to vector<2x32xf32>
      %69 = arith.addf %59, %68 : vector<2x32xf32>
      %70 = math.absf %66 : vector<2x32xf32>
      %cst_31 = arith.constant 0.000000e+00 : f32
      %71 = vector.broadcast %cst_31 : f32 to vector<2x32xf32>
      %72 = arith.subf %71, %70 : vector<2x32xf32>
      %73 = math.exp %72 : vector<2x32xf32>
      %74 = math.log1p %73 : vector<2x32xf32>
      %75 = arith.addf %64, %74 : vector<2x32xf32>
      %76 = arith.select %67, %69, %75 : vector<2x32xi1>, vector<2x32xf32>
      %cst_32 = arith.constant 0.899999976 : f32
      %77 = vector.broadcast %cst_32 : f32 to vector<2x32xf32>
      %78 = arith.mulf %77, %76 : vector<2x32xf32>
      %cst_33 = arith.constant 1.000000e-01 : f32
      %79 = vector.broadcast %cst_33 : f32 to vector<2x32xf32>
      %80 = arith.addf %79, %78 : vector<2x32xf32>
      %81 = arith.select %62, %59, %80 : vector<2x32xi1>, vector<2x32xf32>
      %c0_34 = arith.constant 0 : index
      %c0_35 = arith.constant 0 : index
      %82 = vector.load %arg5[%c0_34, %c0_35] : memref<2x32xf32, #tpu.memory_space<vmem>>, vector<2x32xf32>
      tpu.vector_store %arg5[%c0_34, %c0_35], %81 {strides = array<i32>} : memref<2x32xf32, #tpu.memory_space<vmem>>, vector<2x32xf32>,
    } else {
    }
    return
  }
  func.func @transform_0(%arg0: i32, %arg1: i32) -> (i32, i32, i32) {
    %c0_i32 = arith.constant 0 : i32
    %c0_i32_0 = arith.constant 0 : i32
    return %arg0, %c0_i32, %arg1 : i32, i32, i32
  }
  func.func @transform_1(%arg0: i32, %arg1: i32) -> (i32, i32) {
    %c0_i32 = arith.constant 0 : i32
    %c0_i32_0 = arith.constant 0 : i32
    %c0_i32_1 = arith.constant 0 : i32
    return %c0_i32, %c0_i32_0 : i32, i32
  }
  func.func @transform_2(%arg0: i32, %arg1: i32) -> (i32, i32) {
    %c0_i32 = arith.constant 0 : i32
    %c0_i32_0 = arith.constant 0 : i32
    %c0_i32_1 = arith.constant 0 : i32
    return %c0_i32, %c0_i32_0 : i32, i32
  }
  func.func @transform_3(%arg0: i32, %arg1: i32) -> (i32, i32) {
    %c0_i32 = arith.constant 0 : i32
    %c0_i32_0 = arith.constant 0 : i32
    return %arg0, %c0_i32 : i32, i32
  }
}

</mosaic_0001>

<bundles_post_ra>
// kernel: tpu_custom_call.1
= control target key start
LH: loop header
LB: loop body
LE: loop exit
PB: predicated region body
PF: predicated region fallthrough
CT: control target
= control target key end

     0   :  { %v730_v2 = vmov 0   ;;  %s903_s0 = inlined_call_operand.vmem [shape: f32[2,3,8], index: 0, kind: input, shape index: {}]   ;;  %s904_s1 = inlined_call_operand.vmem [shape: f32[120,32], index: 1, kind: input, shape index: {}]   ;;  %s905_s2 = inlined_call_operand.vmem [shape: f32[3,32], index: 2, kind: input, shape index: {}]   ;;  %s906_s3 = inlined_call_operand.hbm [shape: f32[2,32], index: 3, kind: output, shape index: {}]  }
   0x1   :  { %v32_v0 = vld [vmem:[%s904_s1 + $0x10] sm:$0xff]  ;;  %v30_v1 = vld [vmem:[%s904_s1] sm:$0xff]  ;;  %691 = vset.pattern.permute.xlu1 %v730_v2  ;;  %690 = vset.pattern.permute.xlu0 %v730_v2 }
   0x2   :  { %46 = vperm.xlu1 %691, %v32_v0   ;;  %36 = vperm.xlu0 %690, %v30_v1  }
   0x3   :  { %8 = vsyncpa [#allocation4], 0  ;;  %v33_v3 = vld [vmem:[%s904_s1 + $0x18] sm:$0xff]  ;;  %v31_v4 = vld [vmem:[%s904_s1 + $0x8] sm:$0xff]  ;;  %v731_v5 = vmov 3   ;;  %v732_v6 = vmov 1   ;;  %v54_v10 = vlaneseq }
   0x4   :  { %v733_v7 = vmov 2   ;;  %v28_v17 = vld [vmem:[%s903_s0] sm:$0x7]  ;;  %v29_v30 = vld [vmem:[%s903_s0 + $0x4] sm:$0x7]  ;;  %vm190_vm0 = vcmask 64512  }
   0x5   :  { %v773_v13 = vshrl.u32 %v54_v10, 7  ;;  %vm19_vm1 = vcmask 7168   ;;  %vm736_vm2 = vmmov 0   ;;  %vm312_vm3 = vcmask 130112  }
   0x6   :  { %51 = vperm.xlu1 %691, %v33_v3   ;;  %41 = vperm.xlu0 %690, %v31_v4   ;;  %vm319_vm4 = vcmask 195712   ;;  %vm326_vm5 = vcmask 261312   ;;  %vm347_vm6 = vcmask 1041409   ;;  %vm349_vm7 = vcmask 261120  }
   0x7   :  { %v56_v16 = vsub.s32 0, %v773_v13  ;;  %v112_v18 = vsub.s32 1, %v773_v13  ;;  %v152_v24 = vsub.s32 2, %v773_v13  ;;  %vm504_vm8 = vcmask 195584  }
   0x8   :  { %vm600_vm12 = vcmask 254976  }
   0x9   :  { %v57_v19 = vrot.slane %v28_v17, %v56_v16  ;;  %v113_v23 = vrot.slane %v28_v17, %v112_v18  ;;  %v783_v29 = vrot.slane %v28_v17, %v152_v24  ;;  %v61_v32 = vrot.slane %v29_v30, %v56_v16 }
   0xa   :  { %692 = vset.pattern.permute.xlu1 %v731_v5  ;;  %694 = vset.pattern.permute.xlu0 %v732_v6  ;;  %v117_v39 = vrot.slane %v29_v30, %v112_v18  ;;  %v157_v48 = vrot.slane %v29_v30, %v152_v24 }
   0xb   :  { %75 = vperm.xlu1 %692, %v31_v4   ;;  %99 = vperm.xlu0 %694, %v31_v4  }
   0xf   :  { %693 = vset.pattern.permute.xlu1 %v732_v6  ;;  %695 = vset.pattern.permute.xlu0 %v731_v5 }
  0x10   :  { %95 = vperm.xlu1 %693, %v30_v1   ;;  %71 = vperm.xlu0 %695, %v30_v1  }
  0x14   :  { %696 = vset.pattern.permute.xlu1 %v731_v5  ;;  %83 = vperm.xlu0 %695, %v33_v3  }
  0x15   :  { %79 = vperm.xlu1 %696, %v32_v0  }
  0x18   :  { %699 = vset.pattern.permute.xlu0 %v733_v7 }
  0x19   :  { %697 = vset.pattern.permute.xlu1 %v732_v6  ;;  %139 = vperm.xlu0 %699, %v31_v4  }
  0x1a   :  { %103 = vperm.xlu1 %697, %v32_v0  }
  0x1d   :  { %701 = vset.pattern.permute.xlu0 %v730_v2 }
  0x1e   :  { %107 = vperm.xlu1 %697, %v33_v3  }
  0x22   :  { %698 = vset.pattern.permute.xlu1 %v733_v7 }
  0x23   :  { %135 = vperm.xlu1 %698, %v30_v1  }
  0x27   :  { %143 = vperm.xlu1 %698, %v32_v0  }
  0x2b   :  { %147 = vperm.xlu1 %698, %v33_v3   ;;  %v734_v3 = vmov 0.0  }
  0x2c   :  { %21 = vst.msk [vmem:[#allocation2 + $0x8] sm:$0xff] %vm19_vm1, %v734_v3  ;;  %20 = vst.msk [vmem:[#allocation2] sm:$0xff] %vm19_vm1, %v734_v3  ;;  %644 = vmatprep.mubr.msk.f32.mxu0 %vm736_vm2, %v734_v3  ;;  %655 = vmatprep.mubr.msk.f32.mxu1 %vm736_vm2, %v734_v3 }
  0x2d   :  { %22 = vst.msk [vmem:[#allocation2 + $0x10] sm:$0xff] %vm19_vm1, %v734_v3  ;;  %23 = vst.msk [vmem:[#allocation2 + $0x18] sm:$0xff] %vm19_vm1, %v734_v3 }
  0x2e   :  { %24 = vst.msk [vmem:[#allocation2 + $0x20] sm:$0xff] %vm19_vm1, %v734_v3  ;;  %25 = vst.msk [vmem:[#allocation2 + $0x28] sm:$0xff] %vm19_vm1, %v734_v3 }
  0x2f   :  { %700 = vset.pattern.permute.xlu1 %v730_v2  ;;  %26 = vst.msk [vmem:[#allocation2 + $0x30] sm:$0xff] %vm19_vm1, %v734_v3  ;;  %27 = vst.msk [vmem:[#allocation2 + $0x38] sm:$0xff] %vm19_vm1, %v734_v3 }
  0x81   :  { %v47_v8 = vpop.permute.xlu1 %46  ;;  %v37_v9 = vpop.permute.xlu0 %36 }
  0x82   :  { %v62_v36 = vmul.f32 %v57_v19, %v37_v9  ;;  %v66_v37 = vmul.f32 %v61_v32, %v37_v9  ;;  %v64_v49 = vmul.f32 %v57_v19, %v47_v8  ;;  %v68_v62 = vmul.f32 %v61_v32, %v47_v8 }
  0x85   :  { %v770_v11 = vpop.permute.xlu1 %51  ;;  %v42_v12 = vpop.permute.xlu0 %41 }
  0x86   :  { %v63_v22 = vmul.f32 %v57_v19, %v42_v12  ;;  %v67_v42 = vmul.f32 %v61_v32, %v42_v12  ;;  %v65_v63 = vmul.f32 %v57_v19, %v770_v11  ;;  %v69_v18 = vmul.f32 %v61_v32, %v770_v11 }
  0x8a   :  { %v76_v14 = vpop.permute.xlu1 %75  ;;  %v100_v15 = vpop.permute.xlu0 %99 }
  0x8b   :  { %v87_v27 = vadd.f32 %v76_v14, %v63_v22  ;;  %v119_v28 = vmul.f32 %v113_v23, %v100_v15  ;;  %v91_v50 = vadd.f32 %v76_v14, %v67_v42  ;;  %v123_v51 = vmul.f32 %v117_v39, %v100_v15 }
  0x8d   :  { %v127_v33 = vadd.f32 %v119_v28, %v87_v27  ;;  %v131_v0 = vadd.f32 %v123_v51, %v91_v50 }
  0x8f   :  { %v96_v20 = vpop.permute.xlu1 %95  ;;  %v72_v21 = vpop.permute.xlu0 %71 }
  0x90   :  { %v118_v43 = vmul.f32 %v113_v23, %v96_v20  ;;  %v86_v44 = vadd.f32 %v72_v21, %v62_v36  ;;  %v122_v45 = vmul.f32 %v117_v39, %v96_v20  ;;  %v90_v46 = vadd.f32 %v72_v21, %v66_v37 }
  0x92   :  { %v126_v52 = vadd.f32 %v118_v43, %v86_v44  ;;  %v130_v54 = vadd.f32 %v122_v45, %v90_v46  ;;  %v182_v43 = vld [vmem:[#allocation2] sm:$0xff] }
  0x93   :  { %v781_v25 = vpop.permute.xlu0 %83 }
  0x94   :  { %v80_v26 = vpop.permute.xlu1 %79  ;;  %v89_v14 = vadd.f32 %v781_v25, %v65_v63 }
  0x95   :  { %v88_v58 = vadd.f32 %v80_v26, %v64_v49  ;;  %v92_v8 = vadd.f32 %v80_v26, %v68_v62  ;;  %v93_v26 = vadd.f32 %v781_v25, %v69_v18  ;;  %v186_v49 = vld [vmem:[#allocation2 + $0x20] sm:$0xff] }
  0x96   :  { %v251_v18 = vld [vmem:[%s904_s1 + $0x20] sm:$0xff] }
  0x98   :  { %v140_v31 = vpop.permute.xlu0 %139 }
  0x99   :  { %v159_v34 = vmul.f32 %v783_v29, %v140_v31  ;;  %v104_v35 = vpop.permute.xlu1 %103  ;;  %v163_v59 = vmul.f32 %v157_v48, %v140_v31 }
  0x9a   :  { %v120_v55 = vmul.f32 %v113_v23, %v104_v35  ;;  %v124_v1 = vmul.f32 %v117_v39, %v104_v35 }
  0x9b   :  { %v167_v38 = vadd.f32 %v159_v34, %v127_v33  ;;  %v171_v12 = vadd.f32 %v163_v59, %v131_v0 }
  0x9c   :  { %v128_v4 = vadd.f32 %v120_v55, %v88_v58  ;;  %v132_v19 = vadd.f32 %v124_v1, %v92_v8  ;;  %v187_v55 = vld [vmem:[#allocation2 + $0x28] sm:$0xff]  ;;  %v189_v1 = vld [vmem:[#allocation2 + $0x38] sm:$0xff] }
  0x9d   :  { %v108_v40 = vpop.permute.xlu1 %107  ;;  %v175_v41 = vmax.f32 %v167_v38, 0.0  ;;  %v179_v28 = vmax.f32 %v171_v12, 0.0 }
  0x9e   :  { %v121_v5 = vmul.f32 %v113_v23, %v108_v40  ;;  %v125_v21 = vmul.f32 %v117_v39, %v108_v40  ;;  %v183_v40 = vld [vmem:[#allocation2 + $0x8] sm:$0xff] }
  0x9f   :  { %v194_v47 = vsel %vm190_vm0, %v175_v41, 0.0  ;;  %v206_v36 = vsel %vm190_vm0, %v179_v28, 0.0  ;;  %v255_v28 = vld [vmem:[%s904_s1 + $0x40] sm:$0xff] }
  0xa0   :  { %195 = vadd.xlane.f32.xlu1 %v194_v47  ;;  %v129_v22 = vadd.f32 %v121_v5, %v89_v14  ;;  %v133_v11 = vadd.f32 %v125_v21, %v93_v26  ;;  %v254_v26 = vld [vmem:[%s904_s1 + $0x38] sm:$0xff] }
  0xa2   :  { %v136_v53 = vpop.permute.xlu1 %135 }
  0xa3   :  { %v158_v56 = vmul.f32 %v783_v29, %v136_v53  ;;  %v162_v57 = vmul.f32 %v157_v48, %v136_v53 }
  0xa5   :  { %v166_v60 = vadd.f32 %v158_v56, %v126_v52  ;;  %v170_v61 = vadd.f32 %v162_v57, %v130_v54  ;;  %v185_v54 = vld [vmem:[#allocation2 + $0x18] sm:$0xff] }
  0xa6   :  { %v144_v2 = vpop.permute.xlu1 %143 }
  0xa7   :  { %v160_v6 = vmul.f32 %v783_v29, %v144_v2  ;;  %v174_v7 = vmax.f32 %v166_v60, 0.0  ;;  %v178_v9 = vmax.f32 %v170_v61, 0.0  ;;  %v164_v15 = vmul.f32 %v157_v48, %v144_v2  ;;  %v188_v60 = vld [vmem:[#allocation2 + $0x30] sm:$0xff] }
  0xa9   :  { %v191_v16 = vsel %vm190_vm0, %v174_v7, 0.0  ;;  %v168_v17 = vadd.f32 %v160_v6, %v128_v4  ;;  %v203_v27 = vsel %vm190_vm0, %v178_v9, 0.0  ;;  %v172_v34 = vadd.f32 %v164_v15, %v132_v19  ;;  %v252_v19 = vld [vmem:[%s904_s1 + $0x28] sm:$0xff] }
  0xaa   :  { %v148_v20 = vpop.permute.xlu1 %147  ;;  %192 = vadd.xlane.f32.xlu0 %v191_v16  ;;  %v668_v21 = vpack.c.bf16 %v252_v19, %v251_v18 }
  0xab   :  { %v161_v23 = vmul.f32 %v783_v29, %v148_v20  ;;  %v176_v24 = vmax.f32 %v168_v17, 0.0  ;;  %v165_v30 = vmul.f32 %v157_v48, %v148_v20  ;;  %v180_v29 = vmax.f32 %v172_v34, 0.0  ;;  %v184_v48 = vld [vmem:[#allocation2 + $0x10] sm:$0xff] }
  0xad   :  { %v197_v31 = vsel %vm190_vm0, %v176_v24, 0.0  ;;  %v169_v33 = vadd.f32 %v161_v23, %v129_v22  ;;  %v173_v37 = vadd.f32 %v165_v30, %v133_v11  ;;  %v209_v25 = vsel %vm190_vm0, %v180_v29, 0.0  ;;  %v253_v24 = vld [vmem:[%s904_s1 + $0x30] sm:$0xff]  ;;  %v256_v30 = vld [vmem:[%s904_s1 + $0x48] sm:$0xff] }
  0xae   :  { %198 = vadd.xlane.f32.xlu1 %v197_v31  ;;  %204 = vadd.xlane.f32.xlu0 %v203_v27  ;;  %v735_v22 = vmov 0.0|0.0   ;;  %v671_v27 = vpack.c.bf16 %v254_v26, %v253_v24  ;;  %v674_v31 = vpack.c.bf16 %v256_v30, %v255_v28 }
  0xaf   :  { %v177_v32 = vmax.f32 %v169_v33, 0.0  ;;  %v181_v38 = vmax.f32 %v173_v37, 0.0  ;;  %667 = vmatprep.subr.bf16.mxu0 %v735_v22  ;;  %673 = vmatprep.subr.bf16.mxu1 %v735_v22 }
  0xb0   :  { %669 = vmatpush3.bf16.msra.mxu0 %v668_v21  ;;  %675 = vmatpush3.bf16.msra.mxu1 %v674_v31 }
  0xb1   :  { %v200_v35 = vsel %vm190_vm0, %v177_v32, 0.0  ;;  %v212_v39 = vsel %vm190_vm0, %v181_v38, 0.0  ;;  %670 = vmatprep.subr.bf16.mxu0 %v735_v22  ;;  %676 = vmatprep.subr.bf16.mxu1 %v735_v22  ;;  %v851_v32 = vand.u32 127, %v54_v10 }
  0xb2   :  { %201 = vadd.xlane.f32.xlu1 %v200_v35  ;;  %207 = vadd.xlane.f32.xlu0 %v206_v36 }
  0xb3   :  { %v314_v36 = vadd.s32 4294967280, %v851_v32  ;;  %v307_v29 = vadd.s32 4294967288, %v851_v32  ;;  %v321_v37 = vadd.s32 4294967272, %v851_v32  ;;  %v305_v38 = vsub.s32 %v851_v32, %v773_v13 }
  0xb4   :  { %672 = vmatpush3.bf16.msra.mxu0 %v671_v27  ;;  %vm578_vm11 = vcmp.lt.s32.totalorder %v851_v32, 16 }
  0xb5   :  { %679 = vmatprep.subr.bf16.mxu0 %v735_v22 }
  0xb6   :  { %210 = vadd.xlane.f32.xlu0 %v209_v25 }
  0xba   :  { %213 = vadd.xlane.f32.xlu0 %v212_v39  ;;  %v317_v39 = vsub.s32 %v314_v36, %v773_v13 }
 0x12d   :  { %v196_v41 = vpop.xlane.xlu1 %195 }
 0x12e   :  { %v216_v42 = vadd.f32 %v196_v41, %v183_v40  ;;  %v310_v40 = vsub.s32 %v307_v29, %v773_v13  ;;  %v324_v41 = vsub.s32 %v321_v37, %v773_v13 }
 0x130   :  { %225 = vst.msk [vmem:[#allocation2 + $0x8] sm:$0xff] %vm19_vm1, %v216_v42 }
 0x137   :  { %v193_v44 = vpop.xlane.xlu0 %192  ;;  %v236_v45 = vld [vmem:[#allocation2 + $0x8] sm:$0xff] }
 0x138   :  { %v215_v46 = vadd.f32 %v193_v44, %v182_v43  ;;  %v244_v47 = vmul.f32 0.125, %v236_v45 }
 0x13a   :  { %224 = vst.msk [vmem:[#allocation2] sm:$0xff] %vm19_vm1, %v215_v46  ;;  %281 = vperm.xlu0 %701, %v244_v47  }
 0x13b   :  { %v199_v50 = vpop.xlane.xlu1 %198  ;;  %v205_v51 = vpop.xlane.xlu0 %204 }
 0x13c   :  { %v217_v52 = vadd.f32 %v199_v50, %v184_v48  ;;  %v219_v53 = vadd.f32 %v205_v51, %v186_v49 }
 0x13e   :  { %226 = vst.msk [vmem:[#allocation2 + $0x10] sm:$0xff] %vm19_vm1, %v217_v52  ;;  %228 = vst.msk [vmem:[#allocation2 + $0x20] sm:$0xff] %vm19_vm1, %v219_v53 }
 0x13f   :  { %v202_v56 = vpop.xlane.xlu1 %201  ;;  %v208_v57 = vpop.xlane.xlu0 %207 }
 0x140   :  { %v218_v58 = vadd.f32 %v202_v56, %v185_v54  ;;  %v220_v59 = vadd.f32 %v208_v57, %v187_v55 }
 0x141   :  { %v235_v61 = vld [vmem:[#allocation2] sm:$0xff] }
 0x142   :  { %227 = vst.msk [vmem:[#allocation2 + $0x18] sm:$0xff] %vm19_vm1, %v218_v58  ;;  %229 = vst.msk [vmem:[#allocation2 + $0x28] sm:$0xff] %vm19_vm1, %v220_v59  ;;  %v243_v62 = vmul.f32 0.125, %v235_v61  ;;  %v257_v58 = vld [vmem:[%s904_s1 + $0x50] sm:$0xff]  ;;  %v258_v59 = vld [vmem:[%s904_s1 + $0x58] sm:$0xff] }
 0x143   :  { %v211_v63 = vpop.xlane.xlu0 %210  ;;  %v259_v61 = vld [vmem:[%s904_s1 + $0x60] sm:$0xff] }
 0x144   :  { %v221_v0 = vadd.f32 %v211_v63, %v188_v60  ;;  %278 = vperm.xlu1 %700, %v243_v62   ;;  %v677_v60 = vpack.c.bf16 %v258_v59, %v257_v58  ;;  %v260_v62 = vld [vmem:[%s904_s1 + $0x68] sm:$0xff] }
 0x145   :  { %v239_v2 = vld [vmem:[#allocation2 + $0x20] sm:$0xff]  ;;  %v237_v9 = vld [vmem:[#allocation2 + $0x10] sm:$0xff]  ;;  %v680_v63 = vpack.c.bf16 %v260_v62, %v259_v61 }
 0x146   :  { %230 = vst.msk [vmem:[#allocation2 + $0x30] sm:$0xff] %vm19_vm1, %v221_v0  ;;  %v247_v4 = vmul.f32 0.125, %v239_v2  ;;  %v245_v12 = vmul.f32 0.125, %v237_v9  ;;  %678 = vmatpush3.bf16.msra.mxu1 %v677_v60  ;;  %v616_v0 = vld [vmem:[%s905_s2] ss:$0 sm:$0xff] }
 0x147   :  { %v214_v5 = vpop.xlane.xlu0 %213 }
 0x148   :  { %v222_v6 = vadd.f32 %v214_v5, %v189_v1  ;;  %290 = vperm.xlu1 %700, %v247_v4   ;;  %v261_v5 = vld [vmem:[%s904_s1 + $0x70] sm:$0xff]  ;;  %s737_s1 = smov [#allocation3]  }
 0x149   :  { %v240_v7 = vld [vmem:[#allocation2 + $0x28] sm:$0xff]  ;;  %v238_v16 = vld [vmem:[#allocation2 + $0x18] sm:$0xff] }
 0x14a   :  { %231 = vst.msk [vmem:[#allocation2 + $0x38] sm:$0xff] %vm19_vm1, %v222_v6  ;;  %v248_v8 = vmul.f32 0.125, %v240_v7  ;;  %v246_v17 = vmul.f32 0.125, %v238_v16  ;;  %v618_v6 = vld [vmem:[%s905_s2 + $0x1] ss:$0 sm:$0xff] }
 0x14c   :  { %293 = vperm.xlu1 %700, %v248_v8  }
 0x14d   :  { %v241_v14 = vld [vmem:[#allocation2 + $0x30] sm:$0xff] }
 0x14e   :  { %v249_v15 = vmul.f32 0.125, %v241_v14 }
 0x150   :  { %284 = vperm.xlu1 %700, %v245_v12   ;;  %v620_v12 = vld [vmem:[%s905_s2 + $0x2] ss:$0 sm:$0xff]  ;;  %s608_s2 = sshll.u32 %s737_s1, 4  ;;  %s609_s2 = int_to_ptr.vmem [resolvable:$true] %s608_s2 }
 0x151   :  { %v242_v20 = vld [vmem:[#allocation2 + $0x38] sm:$0xff]  ;;  %s706_s0 = scalar_lea.vmem %s609_s2, 32  ;;  %p711_p1 = scmp.lt.s32.totalorder %s609_s2, %s609_s2 }
 0x152   :  { %v250_v23 = vmul.f32 0.125, %v242_v20  ;;  %p707_p0 = scmp.ne.s32.totalorder %s609_s2, %s706_s0  ;;  %p712_p2 = scmp.lt.s32.totalorder %s706_s0, %s706_s0 }
 0x154   :  { %296 = vperm.xlu1 %700, %v249_v15   ;;  %p713_p3 = por %p712_p2, %p711_p1 }
 0x156   :  { %p714_p4 = pnand %p713_p3, %p707_p0 }
 0x158   :  { %287 = vperm.xlu1 %700, %v246_v17  }
 0x15c   :  { %299 = vperm.xlu1 %700, %v250_v23  }
 0x1b9   :  { %v282_v42 = vpop.permute.xlu0 %281 }
 0x1ba   :  { %v311_v47 = vrot.slane %v282_v42, %v310_v40 }
 0x1c3   :  { %v279_v33 = vpop.permute.xlu1 %278 }
 0x1c4   :  { %v306_v43 = vrot.slane %v279_v33, %v305_v38 }
 0x1c6   :  { %v313_v51 = vsel %vm312_vm3, %v311_v47, %v306_v43 }
 0x1c7   :  { %v291_v34 = vpop.permute.xlu1 %290 }
 0x1c8   :  { %v331_v48 = vrot.slane %v291_v34, %v305_v38 }
 0x1cb   :  { %v294_v11 = vpop.permute.xlu1 %293 }
 0x1cc   :  { %v335_v44 = vrot.slane %v294_v11, %v310_v40 }
 0x1ce   :  { %v336_v52 = vsel %vm312_vm3, %v335_v44, %v331_v48 }
 0x1cf   :  { %v285_v35 = vpop.permute.xlu1 %284 }
 0x1d0   :  { %v318_v45 = vrot.slane %v285_v35, %v317_v39 }
 0x1d2   :  { %v320_v54 = vsel %vm319_vm4, %v318_v45, %v313_v51 }
 0x1d3   :  { %v297_v25 = vpop.permute.xlu1 %296 }
 0x1d4   :  { %v340_v46 = vrot.slane %v297_v25, %v317_v39 }
 0x1d6   :  { %v341_v55 = vsel %vm319_vm4, %v340_v46, %v336_v52 }
 0x1d7   :  { %v288_v10 = vpop.permute.xlu1 %287 }
 0x1d8   :  { %v325_v49 = vrot.slane %v288_v10, %v324_v41 }
 0x1da   :  { %v327_v13 = vsel %vm326_vm5, %v325_v49, %v320_v54 }
 0x1db   :  { %v300_v50 = vpop.permute.xlu1 %299 }
 0x1dc   :  { %v345_v53 = vrot.slane %v300_v50, %v324_v41 }
 0x1de   :  { %v346_v56 = vsel %vm326_vm5, %v345_v53, %v341_v55 }
 0x1df   :  { %v348_v57 = vsel %vm347_vm6, %v346_v56, %v327_v13 }
 0x1e0   :  { %645 = vmatmul.mubr.msk.f32.vlgmr.msra.gmra.mrb[0].mxu0 %vm349_vm7, %v348_v57 }
 0x1e1   :  { %664 = vmatprep.mubr.msk.f32.mxu0 %vm736_vm2, %v734_v3  ;;  %681 = vmatpush3.bf16.msra.mxu0 %v680_v63 }
 0x1e2   :  { %662 = vmatprep.subr.mxu0 %v734_v3 }
 0x1e5   :  { %663 = vmatpush3.msra.mxu0 %v261_v5 }
 0x2b3   :  { %v418_v1 = vpop.f32.mrb[0].mxu0 }
 0x2b4   :  { %v419_v2 = vadd.f32 %v616_v0, %v418_v1  ;;  %v646_v4 = vpop.f32.mrb[1].mxu0 }
 0x2b6   :  { %656 = vmatmul.mubr.msk.f32.vlgmr.msra.gmra.mrb[0].mxu1 %vm349_vm7, %v419_v2 }
 0x389   :  { %v495_v7 = vpop.f32.mrb[0].mxu1 }
 0x38a   :  { %v496_v3 = vadd.f32 %v618_v6, %v495_v7  ;;  %v657_v8 = vpop.f32.mrb[1].mxu1 }
 0x38c   :  { %v499_v9 = vmax.f32 %v496_v3, 0.0 }
 0x38e   :  { %665 = vmatmul.mubr.msk.f32.vlgmr.msra.gmra.mrb[2].mxu0 %vm504_vm8, %v499_v9 }
 0x461   :  { %v574_v14 = vpop.f32.mrb[2].mxu0 }
 0x462   :  { %v575_v15 = vadd.f32 %v620_v12, %v574_v14  ;;  %v666_v16 = vpop.f32.mrb[3].mxu0 }
 0x464   :  { %v582_v17 = vand.u32 2147483647, %v575_v15  ;;  %v579_v30 = vmax.f32 %v575_v15, 0.0  ;;  %vm580_vm10 = vcmp.ne.f32.partialorder %v575_v15, %v575_v15 }
 0x466   :  { %v583_v18 = vsub.f32 0.0, %v582_v17 }
 0x468   :  { %v584_v19 = vmul.f32 1.442695, %v583_v18 }
 0x46a   :  { %702 = vpow2.f32 %v584_v19 }
 0x474   :  { %v703_v20 = vpop.eup %702 }
 0x475   :  { %v586_v21 = vadd.f32 1.0, %v703_v20  ;;  %v589_v22 = vmul.f32 -0.5, %v703_v20  ;;  %v592_v24 = vand.u32 2147483647, %v703_v20 }
 0x477   :  { %704 = vlog2.f32 %v586_v21  ;;  %v590_v23 = vadd.f32 1.0, %v589_v22  ;;  %vm593_vm9 = vcmp.lt.f32.partialorder %v592_v24, 0.0004427343 }
 0x479   :  { %v591_v28 = vmul.f32 %v703_v20, %v590_v23 }
 0x481   :  { %v705_v26 = vpop.eup %704 }
 0x482   :  { %v588_v27 = vmul.f32 0.6931472, %v705_v26 }
 0x484   :  { %v594_v31 = vsel %vm593_vm9, %v591_v28, %v588_v27 }
 0x485   :  { %v595_v33 = vadd.f32 %v594_v31, %v579_v30 }
 0x487   :  { %v596_v34 = vsel %vm580_vm10, %v575_v15, %v595_v33 }
 0x488   :  { %v597_v11 = vmul.f32 0.9, %v596_v34 }
 0x48a   :  { %v598_v35 = vadd.f32 0.1, %v597_v11 }
 0x48c   :  { %v599_v36 = vsel %vm578_vm11, %v575_v15, %v598_v35 }
 0x48d   :  { %601 = vst.msk [vmem:[#allocation3] sm:$0x3] %vm600_vm12, %v599_v36 }
 0x48e   :  { %717 = shalt.err (!%p714_p4)
}
 0x48f   :  { %s718_s26 = scalar_lea.hbm %s906_s3, 32 }
 0x490   :  { %p719_p5 = scmp.ne.s32.totalorder %s906_s3, %s718_s26  ;;  %p722_p6 = scmp.lt.u32.totalorder %s718_s26, %s906_s3 }
 0x492   :  { %p724_p7 = pnand %p722_p6, %p719_p5 }
 0x494   :  { %727 = shalt.err (!%p724_p7)
}
 0x495   :  { %611 = dma.vmem_to_hbm [thread:$0]  %s609_s2, 32, %s906_s3, [#allocation4]  }
 0x496   :  { %728 = dma.done.wait [#allocation4], 32  }
 0x497   :  { %729 = vsyncadd [#allocation4], 4294967264 }
 0x498   :  { %615 = vsyncpa [#allocation4], 1 }

</bundles_post_ra>
